<compile_context>
chip_gen: v6e
topology: v6e:2x2x1
jax: 0.10.0
libtpu: 0.0.40
codegen_flags: <defaults>
</compile_context>

<pallas_src>
import functools
import math

import jax
import jax.numpy as jnp
from jax import lax
from jax.experimental import pallas as pl
from jax.experimental.pallas import tpu as pltpu


def _round_up(x, m):
    return ((x + m - 1) // m) * m


def _choose_tile(s, max_tile):
    """Row tile + padded length for a sequence dim (full-dim block if small)."""
    if s <= max_tile:
        return s, s                      # full-dim block: always a legal block shape
    return max_tile, _round_up(s, max_tile)


def _vmem_limit(block_bytes):
    """Generation-aware VMEM budget (leave headroom for compiler scratch)."""
    try:
        cap = int(pltpu.get_tpu_info().vmem_capacity_bytes)
    except Exception:                    # not on TPU / attribute unavailable
        cap = 64 << 20
    want = int(block_bytes) + (8 << 20)
    return int(max(min(want, (cap * 3) // 4), 32 << 20))


def _head_group_size(d_model, dk, n_proj, heads, itemsize, budget_bytes=8 << 20):
    """Heads per projection grid step so the streamed weight slab stays small."""
    g = heads
    while g > 1 and d_model * n_proj * g * dk * itemsize > budget_bytes:
        g -= 1
        while heads % g:
            g -= 1
    return g


def _stack_weights(weights, biases, heads, dk, g, compute_dtype):
    """[W_p] of (d_model, heads*dk) -> (heads//g, d_model, n_proj*g*dk) slabs."""
    d_model = weights[0].shape[0]
    n_hg = heads // g

    def split_w(w):
        return w.reshape(d_model, n_hg, g * dk).transpose(1, 0, 2)

    def split_b(b):
        return b.reshape(n_hg, 1, g * dk)

    w_stack = jnp.concatenate([split_w(w) for w in weights], axis=-1)
    b_stack = jnp.concatenate([split_b(b) for b in biases], axis=-1)
    return w_stack.astype(compute_dtype), b_stack.astype(jnp.float32)


# ---------------------------------------------------------------------------
# Kernel A: fused projection(s) + head split.
# ---------------------------------------------------------------------------
def _proj_kernel(x_ref, w_ref, b_ref, *out_refs, n_proj, g, dk, out_dtype):
    # (ts, d_model) @ (d_model, n_proj*g*dk) on the MXU, f32 accumulation.
    y = jnp.dot(x_ref[...], w_ref[...], preferred_element_type=jnp.float32)
    y = (y + b_ref[...]).astype(out_dtype)
    for p in range(n_proj):
        for gi in range(g):
            col = (p * g + gi) * dk
            out_refs[p][gi, :, :] = y[:, col:col + dk]


def _project_heads(x, weights, biases, *, heads, dk, row_tile, s_pad, compute_dtype):
    """Fused {Q|K|V} projection + head split.

    Returns one (B, heads, s_pad, dk) tensor per weight, in compute_dtype,
    with no XLA-side transpose."""
    B, S, d_model = x.shape
    n_proj = len(weights)
    if s_pad != S:
        x = jnp.pad(x, ((0, 0), (0, s_pad - S), (0, 0)))
    xc = x.astype(compute_dtype)
    itemsize = jnp.dtype(compute_dtype).itemsize

    g = _head_group_size(d_model, dk, n_proj, heads, itemsize)
    n_hg = heads // g
    w_stack, b_stack = _stack_weights(weights, biases, heads, dk, g, compute_dtype)
    wcols = n_proj * g * dk

    grid = (B, s_pad // row_tile, n_hg)   # head-group innermost: x tile reused
    in_specs = [
        pl.BlockSpec((None, row_tile, d_model), lambda b, si, hg: (b, si, 0)),
        pl.BlockSpec((None, d_model, wcols), lambda b, si, hg: (hg, 0, 0)),
        pl.BlockSpec((None, 1, wcols), lambda b, si, hg: (hg, 0, 0)),
    ]
    out_shape = tuple(jax.ShapeDtypeStruct((B, heads, s_pad, dk), compute_dtype)
                      for _ in range(n_proj))
    out_specs = tuple(pl.BlockSpec((None, g, row_tile, dk),
                                   lambda b, si, hg: (b, hg, si, 0))
                      for _ in range(n_proj))

    block_bytes = (2 * row_tile * d_model * itemsize           # x tile (dbl-buffered)
                   + 2 * d_model * wcols * itemsize            # weight slab
                   + 2 * wcols * 4                             # bias
                   + 2 * n_proj * g * row_tile * dk * itemsize  # output tiles
                   + row_tile * wcols * 4)                     # f32 matmul result
    cost = pl.CostEstimate(
        flops=2 * B * s_pad * d_model * heads * dk * n_proj,
        transcendentals=0,
        bytes_accessed=int(xc.size * itemsize
                           + int(w_stack.size) * itemsize * (s_pad // row_tile)
                           + int(b_stack.size) * 4
                           + n_proj * B * heads * s_pad * dk * itemsize))

    kernel = functools.partial(_proj_kernel, n_proj=n_proj, g=g, dk=dk,
                               out_dtype=compute_dtype)
    outs = pl.pallas_call(
        kernel,
        out_shape=out_shape,
        grid_spec=pltpu.PrefetchScalarGridSpec(
            num_scalar_prefetch=0, grid=grid,
            in_specs=in_specs, out_specs=out_specs),
        compiler_params=pltpu.CompilerParams(
            dimension_semantics=("parallel", "parallel", "parallel"),
            vmem_limit_bytes=_vmem_limit(block_bytes)),
        cost_estimate=cost,
    )(xc, w_stack, b_stack)
    if not isinstance(outs, (tuple, list)):
        outs = (outs,)
    return list(outs)


# ---------------------------------------------------------------------------
# Kernel B: attention fused with the output projection.
# ---------------------------------------------------------------------------
def _attn_kernel(*refs, has_mask, kv_valid, approx_recip):
    if has_mask:
        q_ref, k_ref, v_ref, m_ref, wo_ref, bo_ref, o_ref, acc_ref = refs
    else:
        q_ref, k_ref, v_ref, wo_ref, bo_ref, o_ref, acc_ref = refs
        m_ref = None
    h = pl.program_id(2)

    @pl.when(h == 0)
    def _init():
        acc_ref[...] = jnp.zeros_like(acc_ref)

    q = q_ref[...]                                    # (tq, dk); 1/sqrt(dk) folded in Wq
    k = k_ref[...]                                    # (sk_pad, dk)
    v = v_ref[...]
    s = lax.dot_general(q, k, (((1,), (1,)), ((), ())),
                        preferred_element_type=jnp.float32)          # (tq, sk_pad)
    if m_ref is not None:
        s = s + m_ref[...].astype(jnp.float32)        # additive mask (-1e9 where masked)
    if kv_valid is not None:                          # mask key-padding columns
        col = lax.broadcasted_iota(jnp.int32, s.shape, 1)
        s = jnp.where(col < kv_valid, s, -1e9)
    # NOTE: fully-masked rows yield a uniform softmax (matches the reference).
    s = s - jnp.max(s, axis=-1, keepdims=True)
    p = jnp.exp(s)
    p = p * pl.reciprocal(jnp.sum(p, axis=-1, keepdims=True), approx=approx_recip)
    # Dropout on the attention probabilities is identity (eval mode).
    ctx = jnp.dot(p.astype(v.dtype), v, preferred_element_type=jnp.float32)   # (tq, dk)
    wo = wo_ref[...]
    acc_ref[...] += jnp.dot(ctx.astype(wo.dtype), wo,
                            preferred_element_type=jnp.float32)      # (tq, d_model)

    @pl.when(h == pl.num_programs(2) - 1)
    def _finalize():
        o_ref[...] = (acc_ref[...] + bo_ref[...]).astype(o_ref.dtype)


def _attention_outproj(qh, kh, vh, add_mask, wo, bo, *, tq, kv_valid,
                       compute_dtype, out_dtype=jnp.float32):
    B, H, sq_pad, dk = qh.shape
    sk_pad = kh.shape[2]
    d_model = wo.shape[1]

    wo_h = wo.reshape(H, dk, d_model).astype(compute_dtype)   # pure reshape, no transpose
    bo_r = bo.reshape(1, d_model).astype(jnp.float32)

    grid = (B, sq_pad // tq, H)     # heads innermost = output-projection reduction axis
    in_specs = [
        pl.BlockSpec((None, None, tq, dk), lambda b, qi, h: (b, h, qi, 0)),
        pl.BlockSpec((None, None, sk_pad, dk), lambda b, qi, h: (b, h, 0, 0)),
        pl.BlockSpec((None, None, sk_pad, dk), lambda b, qi, h: (b, h, 0, 0)),
    ]
    args = [qh, kh, vh]
    if add_mask is not None:
        in_specs.append(pl.BlockSpec((None, tq, sk_pad), lambda b, qi, h: (b, qi, 0)))
        args.append(add_mask)
    in_specs += [
        pl.BlockSpec((None, dk, d_model), lambda b, qi, h: (h, 0, 0)),
        pl.BlockSpec((1, d_model), lambda b, qi, h: (0, 0)),
    ]
    args += [wo_h, bo_r]

    cs = jnp.dtype(compute_dtype).itemsize
    block_bytes = (2 * tq * dk * cs                         # q tile
                   + 4 * sk_pad * dk * cs                   # K and V (dbl-buffered)
                   + (2 * tq * sk_pad * cs if add_mask is not None else 0)
                   + 2 * dk * d_model * cs                  # Wo slab
                   + d_model * 4                            # bias
                   + 2 * tq * d_model * 4                   # output tile
                   + tq * d_model * 4                       # f32 accumulator scratch
                   + 2 * tq * sk_pad * 4)                   # f32 score/prob intermediates
    cost = pl.CostEstimate(
        flops=2 * B * H * sq_pad * (2 * sk_pad * dk + dk * d_model),
        transcendentals=B * H * sq_pad * sk_pad,
        bytes_accessed=int(sum(int(a.size) * a.dtype.itemsize for a in args)
                           + B * sq_pad * d_model * jnp.dtype(out_dtype).itemsize))

    kernel = functools.partial(
        _attn_kernel,
        has_mask=add_mask is not None,
        kv_valid=kv_valid,
        approx_recip=(jnp.dtype(compute_dtype) != jnp.dtype(jnp.float32)))

    return pl.pallas_call(
        kernel,
        out_shape=jax.ShapeDtypeStruct((B, sq_pad, d_model), out_dtype),
        grid_spec=pltpu.PrefetchScalarGridSpec(
            num_scalar_prefetch=0, grid=grid,
            in_specs=in_specs,
            out_specs=pl.BlockSpec((None, tq, d_model), lambda b, qi, h: (b, qi, 0)),
            scratch_shapes=[pltpu.VMEM((tq, d_model), jnp.float32)]),
        compiler_params=pltpu.CompilerParams(
            dimension_semantics=("parallel", "parallel", "arbitrary"),
            vmem_limit_bytes=_vmem_limit(block_bytes)),
        cost_estimate=cost,
    )(*args)


# ---------------------------------------------------------------------------
# Full MultiHeadAttention forward.
# ---------------------------------------------------------------------------
def multi_head_attention(q, k, v, params, heads, mask=None, *,
                         compute_dtype=jnp.bfloat16, max_tile=256,
                         out_dtype=jnp.float32):
    """Forward pass of the PyTorch MultiHeadAttention module (eval mode)."""
    wq, bq, wk, bk, wv, bv, wo, bo = params
    B, sq, d_model = q.shape
    sk = k.shape[1]
    assert v.shape[1] == sk and k.shape[0] == B and v.shape[0] == B
    assert d_model % heads == 0 and max_tile % 8 == 0
    dk = d_model // heads

    # Fold 1/sqrt(d_k) into the Q projection (exact; removes a (tq, sk) VPU mul).
    scale = 1.0 / math.sqrt(dk)
    wq_s, bq_s = wq * scale, bq * scale

    tq, sq_pad = _choose_tile(sq, max_tile)
    tk, sk_pad = _choose_tile(sk, max_tile)

    proj = functools.partial(_project_heads, heads=heads, dk=dk,
                             compute_dtype=compute_dtype)
    if q is k and k is v:                      # self-attention: fused QKV projection
        qh, kh, vh = proj(q, [wq_s, wk, wv], [bq_s, bk, bv],
                          row_tile=tq, s_pad=sq_pad)
    elif k is v:                               # shared memory for K and V
        (qh,) = proj(q, [wq_s], [bq_s], row_tile=tq, s_pad=sq_pad)
        kh, vh = proj(k, [wk, wv], [bk, bv], row_tile=tk, s_pad=sk_pad)
    else:                                      # fully distinct inputs
        (qh,) = proj(q, [wq_s], [bq_s], row_tile=tq, s_pad=sq_pad)
        (kh,) = proj(k, [wk], [bk], row_tile=tk, s_pad=sk_pad)
        (vh,) = proj(v, [wv], [bv], row_tile=tk, s_pad=sk_pad)

    add_mask = None
    if mask is not None:
        # (B, sq, sk) (or broadcastable) 0/1 mask -> additive mask in compute dtype.
        am = jnp.where(jnp.broadcast_to(mask, (B, sq, sk)) == 0,
                       jnp.float32(-1e9), jnp.float32(0.0))
        am = jnp.pad(am, ((0, 0), (0, sq_pad - sq), (0, sk_pad - sk)))
        add_mask = am.astype(compute_dtype)

    kv_valid = sk if sk_pad != sk else None
    out = _attention_outproj(qh, kh, vh, add_mask, wo, bo, tq=tq,
                             kv_valid=kv_valid, compute_dtype=compute_dtype,
                             out_dtype=out_dtype)
    return out[:, :sq, :]


def init_params(key, d_model):
    """nn.Linear-style init; weights stored pre-transposed: (in, out)."""
    keys = jax.random.split(key, 8)
    bound = 1.0 / math.sqrt(d_model)

    def lin(kw, kb):
        w = jax.random.uniform(kw, (d_model, d_model), jnp.float32, -bound, bound)
        b = jax.random.uniform(kb, (d_model,), jnp.float32, -bound, bound)
        return w, b

    wq, bq = lin(keys[0], keys[1])
    wk, bk = lin(keys[2], keys[3])
    wv, bv = lin(keys[4], keys[5])
    wo, bo = lin(keys[6], keys[7])
    return (wq, bq, wk, bk, wv, bv, wo, bo)


def mha_reference(q, k, v, params, heads, mask=None):
    """Pure-JAX f32 reference matching the PyTorch forward (eval mode)."""
    wq, bq, wk, bk, wv, bv, wo, bo = params
    B, sq, d_model = q.shape
    sk = k.shape[1]
    dk = d_model // heads

    def sh(x, s):
        return x.reshape(B, s, heads, dk).transpose(0, 2, 1, 3)

    qh = sh(q @ wq + bq, sq)
    kh = sh(k @ wk + bk, sk)
    vh = sh(v @ wv + bv, sk)
    s = jnp.einsum('bhqd,bhkd->bhqk', qh, kh) / math.sqrt(dk)
    if mask is not None:
        s = jnp.where(mask[:, None, :, :] == 0, -1e9, s)
    p = jax.nn.softmax(s, axis=-1)
    ctx = jnp.einsum('bhqk,bhkd->bhqd', p, vh)
    concat = ctx.transpose(0, 2, 1, 3).reshape(B, sq, d_model)
    return concat @ wo + bo


if __name__ == "__main__":
    key = jax.random.PRNGKey(0)
    kx, kk2, kv2, kp, kp3 = jax.random.split(key, 5)

    # ---- Test 1: self-attention (fused QKV), bf16 compute, causal mask.
    B, S, d_model, heads = 2, 8, 32, 4
    x = jax.random.normal(kx, (B, S, d_model), jnp.float32)
    params = init_params(kp, d_model)
    mask = jnp.broadcast_to(jnp.tril(jnp.ones((S, S), jnp.int32)), (B, S, S))
    out1 = jax.block_until_ready(
        multi_head_attention(x, x, x, params, heads, mask=mask))
    ref1 = mha_reference(x, x, x, params, heads, mask=mask)
    assert out1.shape == (B, S, d_model)
    assert jnp.allclose(out1, ref1, atol=5e-2, rtol=5e-2), (
        float(jnp.max(jnp.abs(out1 - ref1))))

    # ---- Test 2: distinct q/k/v inputs (sq != sk), f32 compute, no mask.
    sq2, sk2 = 8, 16
    q2 = jax.random.normal(kk2, (B, sq2, d_model), jnp.float32)
    k2 = jax.random.normal(kv2, (B, sk2, d_model), jnp.float32)
    v2 = jax.random.normal(jax.random.fold_in(kv2, 1), (B, sk2, d_model), jnp.float32)
    out2 = jax.block_until_ready(
        multi_head_attention(q2, k2, v2, params, heads, mask=None,
                             compute_dtype=jnp.float32))
    ref2 = mha_reference(q2, k2, v2, params, heads, mask=None)
    assert out2.shape == (B, sq2, d_model)
    assert jnp.allclose(out2, ref2, atol=5e-3, rtol=5e-3), (
        float(jnp.max(jnp.abs(out2 - ref2))))

    # ---- Test 3: unaligned sequence length -> exercises q/k padding and the
    #      in-kernel key-padding mask (small max_tile forces the padded path).
    B3, S3, d3, h3 = 1, 20, 32, 2
    params3 = init_params(kp3, d3)
    x3 = jax.random.normal(jax.random.fold_in(kx, 3), (B3, S3, d3), jnp.float32)
    out3 = jax.block_until_ready(
        multi_head_attention(x3, x3, x3, params3, h3, mask=None, max_tile=16))
    ref3 = mha_reference(x3, x3, x3, params3, h3, mask=None)
    assert out3.shape == (B3, S3, d3)
    assert jnp.allclose(out3, ref3, atol=5e-2, rtol=5e-2), (
        float(jnp.max(jnp.abs(out3 - ref3))))

    print("KERNEL_OK")
</pallas_src>

<mosaic_0001>
module attributes {stable_mosaic.version = 11 : i64} {
  func.func @_proj_kernel(%arg0: i32, %arg1: i32, %arg2: i32, %arg3: memref<1x8x32xbf16, #tpu.memory_space<vmem>>, %arg4: memref<1x32x96xbf16, #tpu.memory_space<vmem>>, %arg5: memref<1x1x96xf32, #tpu.memory_space<vmem>>, %arg6: memref<1x4x8x8xbf16, #tpu.memory_space<vmem>>, %arg7: memref<1x4x8x8xbf16, #tpu.memory_space<vmem>>, %arg8: memref<1x4x8x8xbf16, #tpu.memory_space<vmem>>) attributes {dimension_semantics = [#tpu.dimension_semantics<parallel>, #tpu.dimension_semantics<parallel>, #tpu.dimension_semantics<parallel>], iteration_bounds = array<i64: 2, 1, 1>, scalar_prefetch = 0 : i64, scratch_operands = 0 : i64, tpu.core_type = #tpu.core_type<tc>, window_params = [{transform_indices = @transform_0, window_bounds = array<i64: 1, 8, 32>}, {transform_indices = @transform_1, window_bounds = array<i64: 1, 32, 96>}, {transform_indices = @transform_2, window_bounds = array<i64: 1, 1, 96>}, {transform_indices = @transform_3, window_bounds = array<i64: 1, 4, 8, 8>}, {transform_indices = @transform_4, window_bounds = array<i64: 1, 4, 8, 8>}, {transform_indices = @transform_5, window_bounds = array<i64: 1, 4, 8, 8>}]} {
    %c0 = arith.constant 0 : index
    %c0_0 = arith.constant 0 : index
    %c0_1 = arith.constant 0 : index
    %0 = vector.load %arg3[%c0, %c0_0, %c0_1] : memref<1x8x32xbf16, #tpu.memory_space<vmem>>, vector<1x8x32xbf16>
    %1 = vector.shape_cast %0 : vector<1x8x32xbf16> to vector<8x32xbf16>
    %c0_2 = arith.constant 0 : index
    %c0_3 = arith.constant 0 : index
    %c0_4 = arith.constant 0 : index
    %2 = vector.load %arg4[%c0_2, %c0_3, %c0_4] : memref<1x32x96xbf16, #tpu.memory_space<vmem>>, vector<1x32x96xbf16>
    %3 = vector.shape_cast %2 : vector<1x32x96xbf16> to vector<32x96xbf16>
    %cst = arith.constant dense<0.000000e+00> : vector<8x96xf32>
    %4 = tpu.matmul %1, %3, %cst {dimension_numbers = #tpu.dot_dimension_numbers<[1], [0], [0], [1], [0, 0, 1, 1], [], []>} : vector<8x32xbf16>, vector<32x96xbf16>, vector<8x96xf32> -> vector<8x96xf32>
    %c0_5 = arith.constant 0 : index
    %c0_6 = arith.constant 0 : index
    %c0_7 = arith.constant 0 : index
    %5 = vector.load %arg5[%c0_5, %c0_6, %c0_7] : memref<1x1x96xf32, #tpu.memory_space<vmem>>, vector<1x1x96xf32>
    %6 = vector.shape_cast %5 : vector<1x1x96xf32> to vector<1x96xf32>
    %7 = vector.broadcast %6 : vector<1x96xf32> to vector<8x96xf32>
    %8 = arith.addf %4, %7 : vector<8x96xf32>
    %9 = arith.truncf %8 : vector<8x96xf32> to vector<8x96xbf16>
    %10 = vector.extract_strided_slice %9 {offsets = [0, 0], sizes = [8, 8], strides = [1, 1]} : vector<8x96xbf16> to vector<8x8xbf16>
    %c0_8 = arith.constant 0 : index
    %c0_9 = arith.constant 0 : index
    %c0_10 = arith.constant 0 : index
    %c0_11 = arith.constant 0 : index
    %11 = vector.load %arg6[%c0_8, %c0_9, %c0_10, %c0_11] : memref<1x4x8x8xbf16, #tpu.memory_space<vmem>>, vector<1x1x8x8xbf16>
    %12 = vector.shape_cast %11 : vector<1x1x8x8xbf16> to vector<8x8xbf16>
    %13 = vector.shape_cast %10 : vector<8x8xbf16> to vector<1x1x8x8xbf16>
    tpu.vector_store %arg6[%c0_8, %c0_9, %c0_10, %c0_11], %13 {strides = array<i32>} : memref<1x4x8x8xbf16, #tpu.memory_space<vmem>>, vector<1x1x8x8xbf16>,
    %14 = vector.extract_strided_slice %9 {offsets = [0, 8], sizes = [8, 8], strides = [1, 1]} : vector<8x96xbf16> to vector<8x8xbf16>
    %c0_12 = arith.constant 0 : index
    %c1 = arith.constant 1 : index
    %c0_13 = arith.constant 0 : index
    %c0_14 = arith.constant 0 : index
    %15 = vector.load %arg6[%c0_12, %c1, %c0_13, %c0_14] : memref<1x4x8x8xbf16, #tpu.memory_space<vmem>>, vector<1x1x8x8xbf16>
    %16 = vector.shape_cast %15 : vector<1x1x8x8xbf16> to vector<8x8xbf16>
    %17 = vector.shape_cast %14 : vector<8x8xbf16> to vector<1x1x8x8xbf16>
    tpu.vector_store %arg6[%c0_12, %c1, %c0_13, %c0_14], %17 {strides = array<i32>} : memref<1x4x8x8xbf16, #tpu.memory_space<vmem>>, vector<1x1x8x8xbf16>,
    %18 = vector.extract_strided_slice %9 {offsets = [0, 16], sizes = [8, 8], strides = [1, 1]} : vector<8x96xbf16> to vector<8x8xbf16>
    %c0_15 = arith.constant 0 : index
    %c2 = arith.constant 2 : index
    %c0_16 = arith.constant 0 : index
    %c0_17 = arith.constant 0 : index
    %19 = vector.load %arg6[%c0_15, %c2, %c0_16, %c0_17] : memref<1x4x8x8xbf16, #tpu.memory_space<vmem>>, vector<1x1x8x8xbf16>
    %20 = vector.shape_cast %19 : vector<1x1x8x8xbf16> to vector<8x8xbf16>
    %21 = vector.shape_cast %18 : vector<8x8xbf16> to vector<1x1x8x8xbf16>
    tpu.vector_store %arg6[%c0_15, %c2, %c0_16, %c0_17], %21 {strides = array<i32>} : memref<1x4x8x8xbf16, #tpu.memory_space<vmem>>, vector<1x1x8x8xbf16>,
    %22 = vector.extract_strided_slice %9 {offsets = [0, 24], sizes = [8, 8], strides = [1, 1]} : vector<8x96xbf16> to vector<8x8xbf16>
    %c0_18 = arith.constant 0 : index
    %c3 = arith.constant 3 : index
    %c0_19 = arith.constant 0 : index
    %c0_20 = arith.constant 0 : index
    %23 = vector.load %arg6[%c0_18, %c3, %c0_19, %c0_20] : memref<1x4x8x8xbf16, #tpu.memory_space<vmem>>, vector<1x1x8x8xbf16>
    %24 = vector.shape_cast %23 : vector<1x1x8x8xbf16> to vector<8x8xbf16>
    %25 = vector.shape_cast %22 : vector<8x8xbf16> to vector<1x1x8x8xbf16>
    tpu.vector_store %arg6[%c0_18, %c3, %c0_19, %c0_20], %25 {strides = array<i32>} : memref<1x4x8x8xbf16, #tpu.memory_space<vmem>>, vector<1x1x8x8xbf16>,
    %26 = vector.extract_strided_slice %9 {offsets = [0, 32], sizes = [8, 8], strides = [1, 1]} : vector<8x96xbf16> to vector<8x8xbf16>
    %c0_21 = arith.constant 0 : index
    %c0_22 = arith.constant 0 : index
    %c0_23 = arith.constant 0 : index
    %c0_24 = arith.constant 0 : index
    %27 = vector.load %arg7[%c0_21, %c0_22, %c0_23, %c0_24] : memref<1x4x8x8xbf16, #tpu.memory_space<vmem>>, vector<1x1x8x8xbf16>
    %28 = vector.shape_cast %27 : vector<1x1x8x8xbf16> to vector<8x8xbf16>
    %29 = vector.shape_cast %26 : vector<8x8xbf16> to vector<1x1x8x8xbf16>
    tpu.vector_store %arg7[%c0_21, %c0_22, %c0_23, %c0_24], %29 {strides = array<i32>} : memref<1x4x8x8xbf16, #tpu.memory_space<vmem>>, vector<1x1x8x8xbf16>,
    %30 = vector.extract_strided_slice %9 {offsets = [0, 40], sizes = [8, 8], strides = [1, 1]} : vector<8x96xbf16> to vector<8x8xbf16>
    %c0_25 = arith.constant 0 : index
    %c1_26 = arith.constant 1 : index
    %c0_27 = arith.constant 0 : index
    %c0_28 = arith.constant 0 : index
    %31 = vector.load %arg7[%c0_25, %c1_26, %c0_27, %c0_28] : memref<1x4x8x8xbf16, #tpu.memory_space<vmem>>, vector<1x1x8x8xbf16>
    %32 = vector.shape_cast %31 : vector<1x1x8x8xbf16> to vector<8x8xbf16>
    %33 = vector.shape_cast %30 : vector<8x8xbf16> to vector<1x1x8x8xbf16>
    tpu.vector_store %arg7[%c0_25, %c1_26, %c0_27, %c0_28], %33 {strides = array<i32>} : memref<1x4x8x8xbf16, #tpu.memory_space<vmem>>, vector<1x1x8x8xbf16>,
    %34 = vector.extract_strided_slice %9 {offsets = [0, 48], sizes = [8, 8], strides = [1, 1]} : vector<8x96xbf16> to vector<8x8xbf16>
    %c0_29 = arith.constant 0 : index
    %c2_30 = arith.constant 2 : index
    %c0_31 = arith.constant 0 : index
    %c0_32 = arith.constant 0 : index
    %35 = vector.load %arg7[%c0_29, %c2_30, %c0_31, %c0_32] : memref<1x4x8x8xbf16, #tpu.memory_space<vmem>>, vector<1x1x8x8xbf16>
    %36 = vector.shape_cast %35 : vector<1x1x8x8xbf16> to vector<8x8xbf16>
    %37 = vector.shape_cast %34 : vector<8x8xbf16> to vector<1x1x8x8xbf16>
    tpu.vector_store %arg7[%c0_29, %c2_30, %c0_31, %c0_32], %37 {strides = array<i32>} : memref<1x4x8x8xbf16, #tpu.memory_space<vmem>>, vector<1x1x8x8xbf16>,
    %38 = vector.extract_strided_slice %9 {offsets = [0, 56], sizes = [8, 8], strides = [1, 1]} : vector<8x96xbf16> to vector<8x8xbf16>
    %c0_33 = arith.constant 0 : index
    %c3_34 = arith.constant 3 : index
    %c0_35 = arith.constant 0 : index
    %c0_36 = arith.constant 0 : index
    %39 = vector.load %arg7[%c0_33, %c3_34, %c0_35, %c0_36] : memref<1x4x8x8xbf16, #tpu.memory_space<vmem>>, vector<1x1x8x8xbf16>
    %40 = vector.shape_cast %39 : vector<1x1x8x8xbf16> to vector<8x8xbf16>
    %41 = vector.shape_cast %38 : vector<8x8xbf16> to vector<1x1x8x8xbf16>
    tpu.vector_store %arg7[%c0_33, %c3_34, %c0_35, %c0_36], %41 {strides = array<i32>} : memref<1x4x8x8xbf16, #tpu.memory_space<vmem>>, vector<1x1x8x8xbf16>,
    %42 = vector.extract_strided_slice %9 {offsets = [0, 64], sizes = [8, 8], strides = [1, 1]} : vector<8x96xbf16> to vector<8x8xbf16>
    %c0_37 = arith.constant 0 : index
    %c0_38 = arith.constant 0 : index
    %c0_39 = arith.constant 0 : index
    %c0_40 = arith.constant 0 : index
    %43 = vector.load %arg8[%c0_37, %c0_38, %c0_39, %c0_40] : memref<1x4x8x8xbf16, #tpu.memory_space<vmem>>, vector<1x1x8x8xbf16>
    %44 = vector.shape_cast %43 : vector<1x1x8x8xbf16> to vector<8x8xbf16>
    %45 = vector.shape_cast %42 : vector<8x8xbf16> to vector<1x1x8x8xbf16>
    tpu.vector_store %arg8[%c0_37, %c0_38, %c0_39, %c0_40], %45 {strides = array<i32>} : memref<1x4x8x8xbf16, #tpu.memory_space<vmem>>, vector<1x1x8x8xbf16>,
    %46 = vector.extract_strided_slice %9 {offsets = [0, 72], sizes = [8, 8], strides = [1, 1]} : vector<8x96xbf16> to vector<8x8xbf16>
    %c0_41 = arith.constant 0 : index
    %c1_42 = arith.constant 1 : index
    %c0_43 = arith.constant 0 : index
    %c0_44 = arith.constant 0 : index
    %47 = vector.load %arg8[%c0_41, %c1_42, %c0_43, %c0_44] : memref<1x4x8x8xbf16, #tpu.memory_space<vmem>>, vector<1x1x8x8xbf16>
    %48 = vector.shape_cast %47 : vector<1x1x8x8xbf16> to vector<8x8xbf16>
    %49 = vector.shape_cast %46 : vector<8x8xbf16> to vector<1x1x8x8xbf16>
    tpu.vector_store %arg8[%c0_41, %c1_42, %c0_43, %c0_44], %49 {strides = array<i32>} : memref<1x4x8x8xbf16, #tpu.memory_space<vmem>>, vector<1x1x8x8xbf16>,
    %50 = vector.extract_strided_slice %9 {offsets = [0, 80], sizes = [8, 8], strides = [1, 1]} : vector<8x96xbf16> to vector<8x8xbf16>
    %c0_45 = arith.constant 0 : index
    %c2_46 = arith.constant 2 : index
    %c0_47 = arith.constant 0 : index
    %c0_48 = arith.constant 0 : index
    %51 = vector.load %arg8[%c0_45, %c2_46, %c0_47, %c0_48] : memref<1x4x8x8xbf16, #tpu.memory_space<vmem>>, vector<1x1x8x8xbf16>
    %52 = vector.shape_cast %51 : vector<1x1x8x8xbf16> to vector<8x8xbf16>
    %53 = vector.shape_cast %50 : vector<8x8xbf16> to vector<1x1x8x8xbf16>
    tpu.vector_store %arg8[%c0_45, %c2_46, %c0_47, %c0_48], %53 {strides = array<i32>} : memref<1x4x8x8xbf16, #tpu.memory_space<vmem>>, vector<1x1x8x8xbf16>,
    %54 = vector.extract_strided_slice %9 {offsets = [0, 88], sizes = [8, 8], strides = [1, 1]} : vector<8x96xbf16> to vector<8x8xbf16>
    %c0_49 = arith.constant 0 : index
    %c3_50 = arith.constant 3 : index
    %c0_51 = arith.constant 0 : index
    %c0_52 = arith.constant 0 : index
    %55 = vector.load %arg8[%c0_49, %c3_50, %c0_51, %c0_52] : memref<1x4x8x8xbf16, #tpu.memory_space<vmem>>, vector<1x1x8x8xbf16>
    %56 = vector.shape_cast %55 : vector<1x1x8x8xbf16> to vector<8x8xbf16>
    %57 = vector.shape_cast %54 : vector<8x8xbf16> to vector<1x1x8x8xbf16>
    tpu.vector_store %arg8[%c0_49, %c3_50, %c0_51, %c0_52], %57 {strides = array<i32>} : memref<1x4x8x8xbf16, #tpu.memory_space<vmem>>, vector<1x1x8x8xbf16>,
    return
  }
  func.func @transform_0(%arg0: i32, %arg1: i32, %arg2: i32) -> (i32, i32, i32) {
    %c0_i32 = arith.constant 0 : i32
    %c0_i32_0 = arith.constant 0 : i32
    return %arg0, %arg1, %c0_i32 : i32, i32, i32
  }
  func.func @transform_1(%arg0: i32, %arg1: i32, %arg2: i32) -> (i32, i32, i32) {
    %c0_i32 = arith.constant 0 : i32
    %c0_i32_0 = arith.constant 0 : i32
    %c0_i32_1 = arith.constant 0 : i32
    return %arg2, %c0_i32, %c0_i32_0 : i32, i32, i32
  }
  func.func @transform_2(%arg0: i32, %arg1: i32, %arg2: i32) -> (i32, i32, i32) {
    %c0_i32 = arith.constant 0 : i32
    %c0_i32_0 = arith.constant 0 : i32
    %c0_i32_1 = arith.constant 0 : i32
    return %arg2, %c0_i32, %c0_i32_0 : i32, i32, i32
  }
  func.func @transform_3(%arg0: i32, %arg1: i32, %arg2: i32) -> (i32, i32, i32, i32) {
    %c0_i32 = arith.constant 0 : i32
    %c0_i32_0 = arith.constant 0 : i32
    return %arg0, %arg2, %arg1, %c0_i32 : i32, i32, i32, i32
  }
  func.func @transform_4(%arg0: i32, %arg1: i32, %arg2: i32) -> (i32, i32, i32, i32) {
    %c0_i32 = arith.constant 0 : i32
    %c0_i32_0 = arith.constant 0 : i32
    return %arg0, %arg2, %arg1, %c0_i32 : i32, i32, i32, i32
  }
  func.func @transform_5(%arg0: i32, %arg1: i32, %arg2: i32) -> (i32, i32, i32, i32) {
    %c0_i32 = arith.constant 0 : i32
    %c0_i32_0 = arith.constant 0 : i32
    return %arg0, %arg2, %arg1, %c0_i32 : i32, i32, i32, i32
  }
}

</mosaic_0001>

<bundles_post_ra>
// kernel: tpu_custom_call.1
= control target key start
LH: loop header
LB: loop body
LE: loop exit
PB: predicated region body
PF: predicated region fallthrough
CT: control target
= control target key end

     0   :  { %s1397_s0 = inlined_call_operand.hbm [shape: bf16[2,8,32], index: 0, kind: input, shape index: {}]   ;;  %s1398_s1 = inlined_call_operand.hbm [shape: bf16[1,32,96], index: 1, kind: input, shape index: {}]   ;;  %s1399_s2 = inlined_call_operand.vmem [shape: f32[1,1,96], index: 2, kind: input, shape index: {}]   ;;  %s1400_s3 = inlined_call_operand.hbm [shape: bf16[2,4,8,8], index: 3, kind: output, shape index: {0}]   ;;  %s1401_s4 = inlined_call_operand.hbm [shape: bf16[2,4,8,8], index: 4, kind: output, shape index: {1}]   ;;  %s1402_s5 = inlined_call_operand.hbm [shape: bf16[2,4,8,8], index: 5, kind: output, shape index: {2}]  }
   0x1   :  { %1406 = sst [smem:[#allocation16_spill]] %s1398_s1 }
   0x2   :  { %11 = vsyncpa [#allocation3], 0 }
   0x3   :  { %13 = vsyncpa [#allocation3 + $0x1], 0 }
   0x4   :  { %14 = vsyncpa [#allocation6], 0 }
   0x5   :  { %15 = vsyncpa [#allocation4], 0 }
   0x6   :  { %17 = vsyncpa [#allocation4 + $0x1], 0 }
   0x7   :  { %18 = vsyncpa [#allocation9], 0 }
   0x8   :  { %20 = vsyncpa [#allocation9 + $0x1], 0  ;;  %s1109_s18 = smov 0   ;;  %s1111_s19 = smov 0  }
   0x9   :  { %s1113_s20 = smov 0   ;;  %s1115_s21 = smov 0  }
   0xa   :  { %s1117_s22 = smov 0   ;;  %s1119_s23 = smov 0  }
   0xb LB: > { %s1140_s24 = sadd.s32 4294967295, %s1056_s23   ;;  %s1403_s25 = sadd.s32 4294967294, %s1056_s23   ;;  %s1056_s23 = sphi %s1119_s23, %s26_s23   ;;  %s1052_s22 = sphi %s1117_s22, %s1427_s22   ;;  %s1048_s21 = sphi %s1115_s21, %s1426_s21   ;;  %s1044_s20 = sphi %s1113_s20, %s1425_s20   ;;  %s1040_s19 = sphi %s1111_s19, %s1424_s19   ;;  %s1036_s18 = sphi %s1109_s18, %s1423_s18  }
   0xc   : > { %p67_p0 = scmp.ne.s32.totalorder %s1040_s19, %s1036_s18  ;;  %p1405_p1 = scmp.eq.s32.totalorder %s1140_s24, 0 }
   0xd   : > { %p153_p3 = scmp.eq.s32.totalorder %s1403_s25, 1  ;;  %p709_p5 = scmp.ge.s32.totalorder %s1056_s23, 1 }
   0xe   : > { %p1151_p4 = por %p1405_p1, %p67_p0  ;;  %p220_p7 = scmp.lt.s32.totalorder %s1056_s23, 3 }
   0xf   : > { %p1156_p6 = por %p153_p3, %p67_p0  ;;  %s1058_s29 = smov [#allocation5]  }
  0x10   : > { %p1161_p8 = pnand %p709_p5, %p220_p7  ;;  %s235_s30 = sshll.u32 %s1058_s29, 4  ;;  %s236_s30 = int_to_ptr.vmem [resolvable:$true] %s235_s30 }
  0x11   : > { %s1408_s27 = scalar_select %p1156_p6, 1, 0 }
  0x12   : > { %p773_p9 = pneg %p1161_p8  ;;  %s45_s7 = sadd.s32 1, %s1052_s22 }
  0x13   : > { %s873_s8 = scalar_lea.vmem %s236_s30, 256  ;;  %p881_p5 = scmp.lt.s32.totalorder %s236_s30, %s236_s30 }
  0x14   : > { %p1170_p11 = pnand %p773_p9, %p1405_p1  ;;  %p874_p13 = scmp.ne.s32.totalorder %s236_s30, %s873_s8 }
  0x15   : > { %p882_p7 = scmp.lt.s32.totalorder %s873_s8, %s873_s8 }
  0x16   : > { %p864_p12 = pneg %p1170_p11 }
  0x17   : > { %p883_p2 = por %p882_p7, %p881_p5 }
  0x18   : > { %p876_p0 = pnand %p874_p13, %p864_p12 }
  0x1a   : > { %p877_p3 = pneg %p876_p0 }
  0x1c   : > { %p884_p6 = pnand %p883_p2, %p877_p3 }
  0x1e   : > { %887 = shalt.err (!%p884_p6)
}
  0x1f   : > { %s1059_s9 = smov 64   ;;  %s1060_s10 = smov 4  }
  0x20   : > { %s1411_s1 = sld [smem:[#allocation16_spill]]  ;;  %p47_p2 = scmp.ge.s32.totalorder %s45_s7, 2 }
  0x21   : > { %s54_s13 = sadd.s32 1, %s1044_s20  ;;  %p61_p6 = scmp.ne.s32.totalorder %s1044_s20, %s1040_s19 }
  0x22   : > { %p62_p9 = scmp.eq.s32.totalorder %s1056_s23, 0  ;;  %s1429_s7 = smov (%p47_p2, %s45_s7), 0 }
  0x23   : > { %1412 = sst [smem:[#allocation15_spill]] %s1429_s7  ;;  %p1414_p13 = scmp.eq.s32.totalorder %s1140_s24, 1 }
  0x24   : > { %p1188_p12 = por %p62_p9, %p61_p6  ;;  %s49_s16 = ssub.s32 %s1052_s22, %s1429_s7 }
  0x25   : > { %p1194_p0 = por %p1414_p13, %p61_p6  ;;  %p792_p3 = scmp.lt.s32.totalorder %s1056_s23, 2 }
  0x26   : > { %776 = dma.hbm_to_vmem [thread:$0]  (!%p1170_p11), %s1411_s1, 256, %s236_s30, [#allocation6], %s1059_s9, %s1059_s9, %s1060_s10  }
  0x27   : > { %p52_p11 = scmp.eq.s32.totalorder %s49_s16, 0  ;;  %s255_s17 = sand.u32 1, %s1044_s20  }
  0x28   : > { %s713_s29 = sshll.u32 %s255_s17, 2  ;;  %s714_s6 = sshll.u32 %s1052_s22, 6 }
  0x29   : > { %s1203_s30 = scalar_select %p52_p11, %s1044_s20, %s54_s13  }
  0x2a   : > { %s265_s10 = scalar_lea.hbm %s1397_s0, %s714_s6  ;;  %s259_s11 = scalar_lea.vmem [#allocation2], %s713_s29 }
  0x2b   : > { %s267_s12 = sshll.u32 %s259_s11, 4  ;;  %p1211_p5 = pnand %p792_p3, %p1188_p12  ;;  %s268_s12 = int_to_ptr.vmem [resolvable:$true] %s267_s12 }
  0x2c   : > { %s256_s1 = scalar_lea.sflag [#allocation3], %s255_s17  ;;  %s901_s16 = scalar_lea.vmem %s268_s12, 64 }
  0x2d   : > { %p890_p7 = pneg %p1211_p5  ;;  %p902_p2 = scmp.ne.s32.totalorder %s268_s12, %s901_s16 }
  0x2e   : > { %s1061_s13 = smov [#allocation2]  }
  0x2f   : > { %p904_p6 = pnand %p902_p2, %p890_p7  ;;  %s906_s7 = sshll.u32 %s1061_s13, 4  ;;  %s907_s7 = int_to_ptr.vmem [resolvable:$false] %s906_s7 }
  0x30   : > { %s908_s6 = scalar_lea.vmem %s907_s7, 128  ;;  %p909_p13 = scmp.lt.s32.totalorder %s268_s12, %s907_s7 }
  0x31   : > { %p905_p9 = pneg %p904_p6  ;;  %p910_p11 = scmp.lt.s32.totalorder %s908_s6, %s901_s16 }
  0x33   : > { %p911_p10 = por %p910_p11, %p909_p13 }
  0x35   : > { %p912_p1 = pnand %p911_p10, %p905_p9 }
  0x37   : > { %915 = shalt.err (!%p912_p1)
}
  0x38   : > { %780 = dma.hbm_to_vmem [thread:$0]  (!%p1211_p5), %s265_s10, 64, %s268_s12, %s256_s1  }
  0x39   : > { %276 = sbr.rel (%p1161_p8) target bundleno = 450 (0x1c2), region = 32  ;;  %s1222_s14 = sand.u32 (!%p1161_p8), 1, %s1040_s19  }
  0x3a   : > { %s716_s17 = sshll.u32 (!%p1161_p8), %s1222_s14, 2  ;;  %s279_s29 = scalar_lea.sflag (!%p1161_p8), [#allocation3], %s1222_s14 }
  0x3b   : > { %s282_s8 = scalar_lea.vmem (!%p1161_p8), [#allocation2], %s716_s17 }
  0x3e   : > { %1019 = dma.done.wait (%p1151_p4), %s279_s29, 64  }
  0x3f   : > { %1021 = vsyncadd (%p1151_p4), %s279_s29, 4294967232  ;;  %p1417_p1 = scmp.eq.s32.totalorder %s1140_s24, 0 }
  0x41   : > { %1023 = dma.done.wait (%p1417_p1), [#allocation6], 256   ;;  %p1418_p10 = pmov %p1417_p1 }
  0x42   : > { %v1062_v0 = vmov 0.0   ;;  %vm1063_vm0 = vmmov 0   ;;  %v860_v1 = vld [vmem:[#allocation5 + $0x8] sm:$0xff]   ;;  %v861_v2 = vld [vmem:[#allocation5] sm:$0xff]   ;;  %v333_v3 = vld [vmem:[%s282_s8] sm:$0xf] }
  0x43   : > { %1025 = vsyncadd (%p1418_p10), [#allocation6], 4294967040  ;;  %753 = vmatprep.subr.bf16.mxu0 %v1062_v0  ;;  %757 = vmatprep.mubr.msk.bf16.mxu0 %vm1063_vm0, %v1062_v0  ;;  %vm357_vm1 = vcmask 261120   ;;  %v721_v4 = vld [vmem:[%s1399_s2] ss:$0 sm:$0xff]  ;;  %s1238_s26 = sshll.u32 %s1222_s14, 4 }
  0x44   : > { %754 = vmatpush3.bf16.msra.mxu0 %v860_v1  ;;  %vm402_vm2 = vcmask 60416   ;;  %s1064_s28 = smov 80   ;;  %s1065_s7 = smov 96  }
  0x45   : > { %755 = vmatprep.subr.bf16.mxu0 %v1062_v0  ;;  %s1241_s9 = scalar_lea.vmem [#allocation7], %s1238_s26  ;;  %s1066_s10 = smov 72  }
  0x46   : > { %s1067_s11 = smov 88   ;;  %s1068_s12 = smov 112  }
  0x47   : > { %s1069_s16 = smov 120   ;;  %s1070_s13 = smov 64  }
  0x48   : > { %756 = vmatpush3.bf16.msra.mxu0 %v861_v2  ;;  %s1071_s6 = smov 104   ;;  %s1072_s17 = smov 48  }
  0x49   : > { %s1073_s29 = smov 56   ;;  %s1074_s8 = smov 40  }
  0x4a   : > { %s318_s1 = scalar_lea.vmem [#allocation8], %s1238_s26 }
  0x4b   : > { %758 = vmatmul.mubr.msk.bf16.vlgmr.msra.gmra.mxu0 %vm357_vm1, %v333_v3  ;;  %s506_s25 = sshll.u32 %s318_s1, 4  ;;  %s1253_s25 = int_to_ptr.vmem [resolvable:$true] %s506_s25 }
 0x10b   : > { %v395_v5 = vpop.f32.mrf.mxu0 }
 0x10c   : > { %v396_v6 = vadd.f32 %v721_v4, %v395_v5 }
 0x10d   : > { %v759_v7 = vpop.f32.mrf.mxu0 }
 0x10e   : > { %v401_v8 = vpack.c.bf16 %v396_v6, %v396_v6 }
 0x10f   : > { %v398_v9 = vpop.f32.mrf.mxu0 }
 0x110   : > { %431 = vrot.lane.b32.xlu1 %v401_v8, %s1064_s28  ;;  %422 = vrot.lane.b32.xlu0 %v401_v8, %s1065_s7  ;;  %403 = vst.msk [vmem:[%s1241_s9] sm:$0xf] %vm402_vm2, %v401_v8  ;;  %s465_s28 = sand.u32 1, %s1140_s24   ;;  %s1249_s7 = sshll.u32 %s1048_s21, 8 }
 0x111   : > { %v760_v10 = vpop.f32.mrf.mxu0  ;;  %s1263_s21 = scalar_lea.sflag [#allocation9], %s465_s28  ;;  %s916_s24 = scalar_lea.vmem %s1253_s25, 256 }
 0x112   : > { %p917_p4 = scmp.ne.s32.totalorder %s1253_s25, %s916_s24 }
 0x114   : > { %436 = vrot.lane.b32.xlu1 %v401_v8, %s1066_s10  ;;  %426 = vrot.lane.b32.xlu0 %v401_v8, %s1067_s11  ;;  %p918_p8 = pnand %p917_p4, %p1194_p0 }
 0x116   : > { %p919_p12 = pneg %p918_p8 }
 0x118   : > { %412 = vrot.lane.b32.xlu1 %v401_v8, %s1068_s12  ;;  %407 = vrot.lane.b32.xlu0 %v401_v8, %s1069_s16  ;;  %s1259_s12 = scalar_lea.hbm %s1401_s4, %s1249_s7  ;;  %s1075_s16 = smov [#allocation8]  }
 0x11c   : > { %441 = vrot.lane.b32.xlu1 %v401_v8, %s1070_s13  ;;  %417 = vrot.lane.b32.xlu0 %v401_v8, %s1071_s6  ;;  %s920_s6 = sshll.u32 %s1075_s16, 4  ;;  %s921_s6 = int_to_ptr.vmem [resolvable:$false] %s920_s6 }
 0x11d   : > { %p923_p3 = scmp.lt.s32.totalorder %s1253_s25, %s921_s6 }
 0x120   : > { %450 = vrot.lane.b32.xlu1 %v401_v8, %s1072_s17  ;;  %445 = vrot.lane.b32.xlu0 %v401_v8, %s1073_s29  ;;  %s922_s17 = scalar_lea.vmem %s921_s6, 512 }
 0x121   : > { %p924_p5 = scmp.lt.s32.totalorder %s922_s17, %s916_s24 }
 0x123   : > { %p925_p7 = por %p924_p5, %p923_p3 }
 0x124   : > { %455 = vrot.lane.b32.xlu0 %v401_v8, %s1074_s8 }
 0x125   : > { %p926_p2 = pnand %p925_p7, %p919_p12 }
 0x182   : > { %v432_v11 = vpop.permute.xlu1 %431  ;;  %v423_v12 = vpop.permute.xlu0 %422 }
 0x183   : > { %730 = vst.msk [vmem:[%s318_s1 + $0x8] sm:$0xf] %vm402_vm2, %v432_v11  ;;  %425 = vst.msk [vmem:[%s318_s1] sm:$0xf] %vm402_vm2, %v423_v12 }
 0x186   : > { %v437_v13 = vpop.permute.xlu1 %436  ;;  %v427_v14 = vpop.permute.xlu0 %426 }
 0x187   : > { %731 = vst.msk [vmem:[%s318_s1 + $0xc] sm:$0xf] %vm402_vm2, %v437_v13  ;;  %729 = vst.msk [vmem:[%s318_s1 + $0x4] sm:$0xf] %vm402_vm2, %v427_v14 }
 0x188   : > { %929 = shalt.err (!%p926_p2)
}
 0x189   : > { %s930_s29 = scalar_lea.hbm %s1259_s12, 256  ;;  %s934_s28 = scalar_lea.hbm %s1401_s4, 512 }
 0x18a   : > { %p931_p6 = scmp.ne.s32.totalorder %s1259_s12, %s930_s29  ;;  %p935_p11 = scmp.lt.s32.totalorder %s1259_s12, %s1401_s4 }
 0x18b   : > { %p936_p1 = scmp.lt.s32.totalorder %s934_s28, %s930_s29 }
 0x18c   : > { %p932_p9 = pnand %p931_p6, %p1194_p0 }
 0x18d   : > { %p937_p10 = por %p936_p1, %p935_p11 }
 0x18e   : > { %p933_p13 = pneg %p932_p9 }
 0x190   : > { %p938_p4 = pnand %p937_p10, %p933_p13 }
 0x192   : > { %941 = shalt.err (!%p938_p4)
}
 0x193   : > { %s1076_s24 = smov 4   ;;  %s487_s16 = sshll.u32 %s1241_s9, 4  ;;  %v413_v15 = vpop.permute.xlu1 %412  ;;  %v408_v16 = vpop.permute.xlu0 %407  ;;  %s1294_s16 = int_to_ptr.vmem [resolvable:$true] %s487_s16 }
 0x194   : > { %768 = dma.vmem_to_hbm [thread:$0]  (%p1194_p0), %s1253_s25, 256, %s1259_s12, %s1263_s21, %s1070_s13, %s1070_s13, %s1076_s24  }
 0x195   : > { %727 = vst.msk [vmem:[%s1241_s9 + $0x8] sm:$0xf] %vm402_vm2, %v413_v15  ;;  %726 = vst.msk [vmem:[%s1241_s9 + $0x4] sm:$0xf] %vm402_vm2, %v408_v16  ;;  %s1300_s29 = scalar_lea.hbm %s1400_s3, %s1249_s7  ;;  %s1303_s25 = scalar_lea.vmem [#allocation10], %s1238_s26 }
 0x196   : > { %s461_s12 = scalar_lea.sflag [#allocation4], %s1222_s14  ;;  %s942_s8 = scalar_lea.vmem %s1294_s16, 256 }
 0x197   : > { %v442_v17 = vpop.permute.xlu1 %441  ;;  %v418_v18 = vpop.permute.xlu0 %417  ;;  %p943_p8 = scmp.ne.s32.totalorder %s1294_s16, %s942_s8  ;;  %s1077_s1 = smov [#allocation7]  }
 0x198   : > { %444 = vst.msk [vmem:[%s1303_s25] sm:$0xf] %vm402_vm2, %v442_v17  ;;  %728 = vst.msk [vmem:[%s1241_s9 + $0xc] sm:$0xf] %vm402_vm2, %v418_v18  ;;  %s946_s28 = sshll.u32 %s1077_s1, 4  ;;  %s947_s28 = int_to_ptr.vmem [resolvable:$false] %s946_s28 }
 0x199   : > { %p944_p12 = pnand %p943_p8, %p1194_p0  ;;  %s948_s10 = scalar_lea.vmem %s947_s28, 512 }
 0x19a   : > { %p949_p5 = scmp.lt.s32.totalorder %s1294_s16, %s947_s28  ;;  %p950_p7 = scmp.lt.s32.totalorder %s948_s10, %s942_s8 }
 0x19b   : > { %p945_p3 = pneg %p944_p12 }
 0x19c   : > { %p951_p2 = por %p950_p7, %p949_p5 }
 0x19e   : > { %p952_p6 = pnand %p951_p2, %p945_p3 }
 0x1a0   : > { %955 = shalt.err (!%p952_p6)
}
 0x1a1   : > { %s956_s26 = scalar_lea.hbm %s1300_s29, 256  ;;  %s960_s11 = scalar_lea.hbm %s1400_s3, 512 }
 0x1a2   : > { %p957_p9 = scmp.ne.s32.totalorder %s1300_s29, %s956_s26  ;;  %p961_p1 = scmp.lt.s32.totalorder %s1300_s29, %s1400_s3 }
 0x1a3   : > { %p962_p10 = scmp.lt.s32.totalorder %s960_s11, %s956_s26 }
 0x1a4   : > { %p958_p13 = pnand %p957_p9, %p1194_p0 }
 0x1a5   : > { %p963_p4 = por %p962_p10, %p961_p1 }
 0x1a6   : > { %p959_p11 = pneg %p958_p13 }
 0x1a8   : > { %p964_p8 = pnand %p963_p4, %p959_p11 }
 0x1aa   : > { %967 = shalt.err (!%p964_p8)
}
 0x1ab   : > { %767 = dma.vmem_to_hbm [thread:$0]  (%p1194_p0), %s1294_s16, 256, %s1300_s29, %s461_s12, %s1070_s13, %s1070_s13, %s1076_s24   ;;  %v451_v19 = vpop.permute.xlu1 %450  ;;  %v446_v20 = vpop.permute.xlu0 %445 }
 0x1ac   : > { %s525_s8 = sshll.u32 %s1303_s25, 4  ;;  %733 = vst.msk [vmem:[%s1303_s25 + $0x8] sm:$0xf] %vm402_vm2, %v451_v19  ;;  %732 = vst.msk [vmem:[%s1303_s25 + $0x4] sm:$0xf] %vm402_vm2, %v446_v20  ;;  %s1344_s10 = scalar_lea.hbm %s1402_s5, %s1249_s7  ;;  %s1338_s8 = int_to_ptr.vmem [resolvable:$true] %s525_s8 }
 0x1ad   : > { %s968_s16 = scalar_lea.vmem %s1338_s8, 256  ;;  %s1078_s29 = smov [#allocation10]  }
 0x1ae   : > { %p969_p12 = scmp.ne.s32.totalorder %s1338_s8, %s968_s16  ;;  %s972_s12 = sshll.u32 %s1078_s29, 4  ;;  %s973_s12 = int_to_ptr.vmem [resolvable:$false] %s972_s12 }
 0x1af   : > { %v456_v21 = vpop.permute.xlu0 %455  ;;  %s974_s26 = scalar_lea.vmem %s973_s12, 512  ;;  %p975_p7 = scmp.lt.s32.totalorder %s1338_s8, %s973_s12 }
 0x1b0   : > { %734 = vst.msk [vmem:[%s1303_s25 + $0xc] sm:$0xf] %vm402_vm2, %v456_v21  ;;  %p970_p3 = pnand %p969_p12, %p1194_p0  ;;  %p976_p2 = scmp.lt.s32.totalorder %s974_s26, %s968_s16 }
 0x1b2   : > { %p971_p5 = pneg %p970_p3  ;;  %p977_p6 = por %p976_p2, %p975_p7 }
 0x1b4   : > { %p978_p9 = pnand %p977_p6, %p971_p5 }
 0x1b6   : > { %981 = shalt.err (!%p978_p9)
}
 0x1b7   : > { %s982_s7 = scalar_lea.hbm %s1344_s10, 256  ;;  %s986_s9 = scalar_lea.hbm %s1402_s5, 512 }
 0x1b8   : > { %p983_p13 = scmp.ne.s32.totalorder %s1344_s10, %s982_s7  ;;  %p987_p10 = scmp.lt.s32.totalorder %s1344_s10, %s1402_s5 }
 0x1b9   : > { %p988_p4 = scmp.lt.s32.totalorder %s986_s9, %s982_s7 }
 0x1ba   : > { %p984_p11 = pnand %p983_p13, %p1194_p0 }
 0x1bb   : > { %p989_p8 = por %p988_p4, %p987_p10 }
 0x1bc   : > { %p985_p1 = pneg %p984_p11 }
 0x1be   : > { %p990_p12 = pnand %p989_p8, %p985_p1 }
 0x1c0   : > { %993 = shalt.err (!%p990_p12)
}
 0x1c1   : > { %769 = dma.vmem_to_hbm [thread:$0]  (%p1194_p0), %s1338_s8, 256, %s1344_s10, %s1263_s21, %s1070_s13, %s1070_s13, %s1076_s24  }
 0x1c2 PF: > { %s540_s17 = sand.u32 1, %s1036_s18   ;;  %p1419_p3 = scmp.ne.s32.totalorder %s1408_s27, 0 }
 0x1c3   : > { %p1420_p5 = scmp.ge.s32.totalorder %s1056_s23, 2  ;;  %s541_s1 = scalar_lea.sflag [#allocation4], %s540_s17 }
 0x1c5   : > { %p782_p7 = pnand %p1420_p5, %p1419_p3 }
 0x1c7   : > { %p783_p2 = pneg %p782_p7 }
 0x1c9   : > { %1027 = dma.done.wait (%p783_p2), %s541_s1, 256  }
 0x1ca   : > { %1029 = vsyncadd (%p783_p2), %s541_s1, 4294967040  ;;  %s1421_s15 = sadd.s32 4294967294, %s1056_s23  }
 0x1cb   : > { %s549_s28 = sand.u32 1, %s1421_s15  }
 0x1cc   : > { %s550_s16 = scalar_lea.sflag [#allocation9], %s549_s28 }
 0x1cd   : > { %1031 = dma.done.wait (%p783_p2), %s550_s16, 512  }
 0x1ce   : > { %1033 = vsyncadd (%p783_p2), %s550_s16, 4294966784  ;;  %s26_s23 = sadd.s32 1, %s1056_s23   ;;  %s1422_s27 = sld [smem:[#allocation15_spill]] }
 0x1cf   : > { %p23_p0 = scmp.ge.s32.totalorder %s26_s23, 4   ;;  %s1423_s18 = smov %s1040_s19 }
 0x1d0   : > { %s1424_s19 = smov %s1044_s20  ;;  %s1425_s20 = smov %s1203_s30 }
 0x1d1   : > { %s1426_s21 = smov %s1052_s22  ;;  %25 = sbr.rel (!%p23_p0) target bundleno = 11 (0xb), region = 126 }
 0x1d4   : > { %s1427_s22 = smov %s1422_s27 }
 0x1d6   :  { %564 = vsyncpa [#allocation3], 1 }
 0x1d7   :  { %566 = vsyncpa [#allocation3 + $0x1], 1 }
 0x1d8   :  { %567 = vsyncpa [#allocation6], 1 }
 0x1d9   :  { %568 = vsyncpa [#allocation4], 1 }
 0x1da   :  { %570 = vsyncpa [#allocation4 + $0x1], 1 }
 0x1db   :  { %571 = vsyncpa [#allocation9], 1 }
 0x1dc   :  { %573 = vsyncpa [#allocation9 + $0x1], 1 }

</bundles_post_ra>
